<compile_context>
chip_gen: v7x
topology: tpu7x:2x2x1
jax: 0.10.0
libtpu: 0.0.40
codegen_flags: <defaults>
</compile_context>

<pallas_src>
import functools
import math

import jax
import jax.numpy as jnp
from jax.experimental import pallas as pl
from jax.experimental.pallas import tpu as pltpu


def _flash_qkv_kernel(q_ref, k_ref, v_ref, o_ref, m_sc, l_sc, acc_sc, *,
                      scale, mxu_dtype, approx_recip):
    """One (batch, head-block, query-tile, key-tile) grid step.

    q_ref: (Hb, C, Tq)   k_ref, v_ref: (Hb, C, Tk)   o_ref: (Hb, C, Tq)
    Scratch (persists across the innermost key-tile axis):
      m_sc, l_sc: (Hb, 1, Tq) f32   acc_sc: (Hb, C, Tq) f32
    """
    kk = pl.program_id(3)

    @pl.when(kk == 0)
    def _():
        m_sc[...] = jnp.full(m_sc.shape, -jnp.inf, jnp.float32)
        l_sc[...] = jnp.zeros(l_sc.shape, jnp.float32)
        acc_sc[...] = jnp.zeros(acc_sc.shape, jnp.float32)

    # Fold the full 1/sqrt(ch) into q only (single scaling pass, done in f32).
    q = (q_ref[...].astype(jnp.float32) * scale).astype(mxu_dtype)
    k = k_ref[...].astype(mxu_dtype)
    v = v_ref[...].astype(mxu_dtype)

    # Scores in (key, query) orientation: s[h, s, t] = sum_c k[h,c,s] q[h,c,t].
    # Softmax statistics then come out lane-oriented (Hb, 1, Tq).
    s = jnp.einsum('hcs,hct->hst', k, q,
                   preferred_element_type=jnp.float32)           # (Hb,Tk,Tq) f32

    m_prev = m_sc[...]                                           # (Hb,1,Tq)
    m_new = jnp.maximum(m_prev, jnp.max(s, axis=1, keepdims=True))
    alpha = jnp.exp(m_prev - m_new)                              # (Hb,1,Tq)
    p = jnp.exp(s - m_new)                                       # (Hb,Tk,Tq) f32

    l_sc[...] = alpha * l_sc[...] + jnp.sum(p, axis=1, keepdims=True)
    acc_sc[...] = alpha * acc_sc[...] + jnp.einsum(
        'hcs,hst->hct', v, p.astype(mxu_dtype),
        preferred_element_type=jnp.float32)                      # (Hb,C,Tq)
    m_sc[...] = m_new

    @pl.when(kk == pl.num_programs(3) - 1)
    def _():
        # Deferred normalization: rescale only C*Tq values.
        inv_l = pl.reciprocal(l_sc[...], approx=approx_recip)
        o_ref[...] = (acc_sc[...] * inv_l).astype(o_ref.dtype)


def _is_v5e() -> bool:
    try:
        dev = jax.devices()[0]
        if dev.platform != "tpu":
            return False
        kind = dev.device_kind.lower()
        return ("v5 lite" in kind) or ("v5e" in kind) or ("v5lite" in kind)
    except Exception:
        return False


def _pick_tile(length: int, candidates) -> int:
    for c in candidates:
        if length % c == 0:
            return c
    return length           # odd / short T: single (full-dim) tile


def _pick_head_block(n_heads: int, ch: int, tq: int, tk: int) -> int:
    """Batch heads per grid step when the per-head contraction depth is small.

    Caps: Hb*ch <= 128 sublanes, (Hb,Tk,Tq) f32 exp tile <= 2 MiB, Hb <= 8.
    """
    if ch > 32:
        return 1
    best = 1
    for cand in range(1, min(n_heads, 8) + 1):
        if n_heads % cand:
            continue
        if cand * ch > 128:
            continue
        if cand * tq * tk * 4 > (2 << 20):
            continue
        best = cand
    return best


def qkv_attention(qkv: jax.Array, n_heads: int, *,
                  use_bf16_mxu: bool = False) -> jax.Array:
    """Pallas port of QKVAttention.forward: [N, 3*H*C, T] -> [N, H*C, T]."""
    bs, width, length = qkv.shape
    assert width % (3 * n_heads) == 0
    ch = width // (3 * n_heads)
    scale = 1.0 / math.sqrt(ch)              # == (ch ** -0.25) ** 2, q-side only

    # Free reshape exposing the chunk(3, dim=1) layout and the heads:
    # element (n, s, h, c, t) == qkv[n, s*H*C + h*C + c, t].
    qkv5 = qkv.reshape(bs, 3, n_heads, ch, length)

    # Generation-aware query tile: 128 on v5e, 256 on v6e/v7x (lane-dense).
    tq = _pick_tile(length, (128,) if _is_v5e() else (256, 128))
    # Key tile for the online-softmax sweep (bounds all intermediates).
    tk = _pick_tile(length, (512, 256, 128))
    hb = _pick_head_block(n_heads, ch, tq, tk)

    grid = (bs, n_heads // hb, length // tq, length // tk)

    mxu_dtype = jnp.bfloat16 if use_bf16_mxu else qkv.dtype
    approx_recip = qkv.dtype != jnp.float32   # EUP reciprocal for bf16 outputs

    kernel = functools.partial(_flash_qkv_kernel, scale=scale,
                               mxu_dtype=mxu_dtype, approx_recip=approx_recip)

    # qkv5 is passed three times; the BlockSpecs select the q / k / v planes,
    # so the only HBM traffic is the kernel's own tile DMAs.
    q_spec = pl.BlockSpec((None, None, hb, ch, tq),
                          lambda n, h, qi, kk: (n, 0, h, 0, qi))
    k_spec = pl.BlockSpec((None, None, hb, ch, tk),
                          lambda n, h, qi, kk: (n, 1, h, 0, kk))
    v_spec = pl.BlockSpec((None, None, hb, ch, tk),
                          lambda n, h, qi, kk: (n, 2, h, 0, kk))
    o_spec = pl.BlockSpec((None, hb, ch, tq),
                          lambda n, h, qi, kk: (n, h, 0, qi))

    out = pl.pallas_call(
        kernel,
        out_shape=jax.ShapeDtypeStruct((bs, n_heads, ch, length), qkv.dtype),
        grid_spec=pltpu.PrefetchScalarGridSpec(
            num_scalar_prefetch=0,
            grid=grid,
            in_specs=[q_spec, k_spec, v_spec],
            out_specs=o_spec,
            scratch_shapes=[
                pltpu.VMEM((hb, 1, tq), jnp.float32),    # running max  m
                pltpu.VMEM((hb, 1, tq), jnp.float32),    # running sum  l
                pltpu.VMEM((hb, ch, tq), jnp.float32),   # unnormalized P.V acc
            ],
        ),
        compiler_params=pltpu.CompilerParams(
            # batch / head-block / query-tile produce disjoint output blocks
            # -> shard across TensorCores on v7x; the key-tile axis is the
            # online-softmax reduction and must stay sequential (innermost).
            dimension_semantics=("parallel", "parallel", "parallel",
                                 "arbitrary")),
    )(qkv5, qkv5, qkv5)

    return out.reshape(bs, n_heads * ch, length)


def _reference(qkv: jax.Array, n_heads: int) -> jax.Array:
    """Pure-JAX reference mirroring the PyTorch QKVAttention.forward."""
    bs, width, length = qkv.shape
    ch = width // (3 * n_heads)
    q, k, v = jnp.split(qkv, 3, axis=1)            # chunk(3, dim=1)
    scale = 1.0 / math.sqrt(math.sqrt(ch))
    q = (q * scale).reshape(bs * n_heads, ch, length)
    k = (k * scale).reshape(bs * n_heads, ch, length)
    v = v.reshape(bs * n_heads, ch, length)
    w = jnp.einsum('bct,bcs->bts', q, k)
    w = jax.nn.softmax(w.astype(jnp.float32), axis=-1).astype(w.dtype)
    a = jnp.einsum('bts,bcs->bct', w, v)
    return a.reshape(bs, -1, length)


if __name__ == "__main__":
    # QKVAttention has no learnable parameters; only n_heads.
    # Config 1: tiny shape matching the module (exercises head-batched,
    # single-tile path): N=2, heads=2, ch=8, T=16.
    n_heads, N, C, T = 2, 2, 8, 16
    qkv = jax.random.normal(jax.random.PRNGKey(0),
                            (N, 3 * n_heads * C, T), dtype=jnp.float32)
    out = jax.block_until_ready(qkv_attention(qkv, n_heads))
    ref = _reference(qkv, n_heads)
    assert out.shape == (N, n_heads * C, T)
    assert jnp.allclose(out, ref, atol=2e-4, rtol=2e-4), float(
        jnp.max(jnp.abs(out - ref)))

    # Config 2: modest T=384 to exercise the multi-tile online-softmax path
    # (3 query tiles x 3 key tiles per head on every TPU generation).
    n_heads2, N2, C2, T2 = 2, 1, 64, 384
    qkv2 = jax.random.normal(jax.random.PRNGKey(0),
                             (N2, 3 * n_heads2 * C2, T2), dtype=jnp.float32)
    out2 = jax.block_until_ready(qkv_attention(qkv2, n_heads2))
    ref2 = _reference(qkv2, n_heads2)
    assert out2.shape == (N2, n_heads2 * C2, T2)
    assert jnp.allclose(out2, ref2, atol=2e-4, rtol=2e-4), float(
        jnp.max(jnp.abs(out2 - ref2)))

    print("KERNEL_OK")
</pallas_src>

<mosaic_0001>
module attributes {stable_mosaic.version = 11 : i64} {
  func.func @_flash_qkv_kernel(%arg0: i32, %arg1: i32, %arg2: i32, %arg3: i32, %arg4: memref<1x1x2x8x16xf32, #tpu.memory_space<vmem>>, %arg5: memref<1x1x2x8x16xf32, #tpu.memory_space<vmem>>, %arg6: memref<1x1x2x8x16xf32, #tpu.memory_space<vmem>>, %arg7: memref<1x2x8x16xf32, #tpu.memory_space<vmem>>, %arg8: memref<2x1x16xf32, #tpu.memory_space<vmem>>, %arg9: memref<2x1x16xf32, #tpu.memory_space<vmem>>, %arg10: memref<2x8x16xf32, #tpu.memory_space<vmem>>) attributes {dimension_semantics = [#tpu.dimension_semantics<parallel>, #tpu.dimension_semantics<parallel>, #tpu.dimension_semantics<parallel>, #tpu.dimension_semantics<arbitrary>], iteration_bounds = array<i64: 2, 1, 1, 1>, scalar_prefetch = 0 : i64, scratch_operands = 3 : i64, tpu.core_type = #tpu.core_type<tc>, window_params = [{transform_indices = @transform_0, window_bounds = array<i64: 1, 1, 2, 8, 16>}, {transform_indices = @transform_1, window_bounds = array<i64: 1, 1, 2, 8, 16>}, {transform_indices = @transform_2, window_bounds = array<i64: 1, 1, 2, 8, 16>}, {transform_indices = @transform_3, window_bounds = array<i64: 1, 2, 8, 16>}]} {
    %c0_i32 = arith.constant 0 : i32
    %0 = arith.cmpi eq, %arg3, %c0_i32 : i32
    %1 = arith.extui %0 : i1 to i32
    %c0_i32_0 = arith.constant 0 : i32
    %2 = arith.cmpi ne, %1, %c0_i32_0 : i32
    scf.if %2 {
      %cst_39 = arith.constant 0xFF800000 : f32
      %37 = vector.broadcast %cst_39 : f32 to vector<2x1x16xf32>
      %c0_40 = arith.constant 0 : index
      %c0_41 = arith.constant 0 : index
      %c0_42 = arith.constant 0 : index
      %38 = vector.load %arg8[%c0_40, %c0_41, %c0_42] : memref<2x1x16xf32, #tpu.memory_space<vmem>>, vector<2x1x16xf32>
      tpu.vector_store %arg8[%c0_40, %c0_41, %c0_42], %37 {strides = array<i32>} : memref<2x1x16xf32, #tpu.memory_space<vmem>>, vector<2x1x16xf32>,
      %cst_43 = arith.constant 0.000000e+00 : f32
      %39 = vector.broadcast %cst_43 : f32 to vector<2x1x16xf32>
      %c0_44 = arith.constant 0 : index
      %c0_45 = arith.constant 0 : index
      %c0_46 = arith.constant 0 : index
      %40 = vector.load %arg9[%c0_44, %c0_45, %c0_46] : memref<2x1x16xf32, #tpu.memory_space<vmem>>, vector<2x1x16xf32>
      tpu.vector_store %arg9[%c0_44, %c0_45, %c0_46], %39 {strides = array<i32>} : memref<2x1x16xf32, #tpu.memory_space<vmem>>, vector<2x1x16xf32>,
      %cst_47 = arith.constant 0.000000e+00 : f32
      %41 = vector.broadcast %cst_47 : f32 to vector<2x8x16xf32>
      %c0_48 = arith.constant 0 : index
      %c0_49 = arith.constant 0 : index
      %c0_50 = arith.constant 0 : index
      %42 = vector.load %arg10[%c0_48, %c0_49, %c0_50] : memref<2x8x16xf32, #tpu.memory_space<vmem>>, vector<2x8x16xf32>
      tpu.vector_store %arg10[%c0_48, %c0_49, %c0_50], %41 {strides = array<i32>} : memref<2x8x16xf32, #tpu.memory_space<vmem>>, vector<2x8x16xf32>,
    } else {
    }
    %c0 = arith.constant 0 : index
    %c0_1 = arith.constant 0 : index
    %c0_2 = arith.constant 0 : index
    %c0_3 = arith.constant 0 : index
    %c0_4 = arith.constant 0 : index
    %3 = vector.load %arg4[%c0, %c0_1, %c0_2, %c0_3, %c0_4] : memref<1x1x2x8x16xf32, #tpu.memory_space<vmem>>, vector<1x1x2x8x16xf32>
    %4 = vector.shape_cast %3 : vector<1x1x2x8x16xf32> to vector<2x8x16xf32>
    %cst = arith.constant 0.353553385 : f32
    %5 = vector.broadcast %cst : f32 to vector<2x8x16xf32>
    %6 = arith.mulf %4, %5 : vector<2x8x16xf32>
    %c0_5 = arith.constant 0 : index
    %c0_6 = arith.constant 0 : index
    %c0_7 = arith.constant 0 : index
    %c0_8 = arith.constant 0 : index
    %c0_9 = arith.constant 0 : index
    %7 = vector.load %arg5[%c0_5, %c0_6, %c0_7, %c0_8, %c0_9] : memref<1x1x2x8x16xf32, #tpu.memory_space<vmem>>, vector<1x1x2x8x16xf32>
    %8 = vector.shape_cast %7 : vector<1x1x2x8x16xf32> to vector<2x8x16xf32>
    %c0_10 = arith.constant 0 : index
    %c0_11 = arith.constant 0 : index
    %c0_12 = arith.constant 0 : index
    %c0_13 = arith.constant 0 : index
    %c0_14 = arith.constant 0 : index
    %9 = vector.load %arg6[%c0_10, %c0_11, %c0_12, %c0_13, %c0_14] : memref<1x1x2x8x16xf32, #tpu.memory_space<vmem>>, vector<1x1x2x8x16xf32>
    %10 = vector.shape_cast %9 : vector<1x1x2x8x16xf32> to vector<2x8x16xf32>
    "tpu.trace_start"() <{level = 10 : i32, message = "hcs,hct->hst"}> : () -> ()
    %cst_15 = arith.constant dense<0.000000e+00> : vector<2x16x16xf32>
    %11 = tpu.matmul %8, %6, %cst_15 {dimension_numbers = #tpu.dot_dimension_numbers<[1], [1], [2], [2], [0, 0, 0, 2, 1, 2], [0], [0]>} : vector<2x8x16xf32>, vector<2x8x16xf32>, vector<2x16x16xf32> -> vector<2x16x16xf32>
    "tpu.trace_stop"() : () -> ()
    %c0_16 = arith.constant 0 : index
    %c0_17 = arith.constant 0 : index
    %c0_18 = arith.constant 0 : index
    %12 = vector.load %arg8[%c0_16, %c0_17, %c0_18] : memref<2x1x16xf32, #tpu.memory_space<vmem>>, vector<2x1x16xf32>
    %cst_19 = arith.constant dense<0xFF800000> : vector<2x16xf32>
    %13 = vector.multi_reduction <maximumf>, %11, %cst_19 [1] : vector<2x16x16xf32> to vector<2x16xf32>
    %14 = vector.shape_cast %13 : vector<2x16xf32> to vector<2x1x16xf32>
    %15 = arith.maximumf %12, %14 : vector<2x1x16xf32>
    %16 = arith.subf %12, %15 : vector<2x1x16xf32>
    %17 = math.exp %16 : vector<2x1x16xf32>
    %18 = vector.broadcast %15 : vector<2x1x16xf32> to vector<2x16x16xf32>
    %19 = arith.subf %11, %18 : vector<2x16x16xf32>
    %20 = math.exp %19 : vector<2x16x16xf32>
    %c0_20 = arith.constant 0 : index
    %c0_21 = arith.constant 0 : index
    %c0_22 = arith.constant 0 : index
    %21 = vector.load %arg9[%c0_20, %c0_21, %c0_22] : memref<2x1x16xf32, #tpu.memory_space<vmem>>, vector<2x1x16xf32>
    %22 = arith.mulf %17, %21 : vector<2x1x16xf32>
    %cst_23 = arith.constant dense<0.000000e+00> : vector<2x16xf32>
    %23 = vector.multi_reduction <add>, %20, %cst_23 [1] : vector<2x16x16xf32> to vector<2x16xf32>
    %24 = vector.shape_cast %23 : vector<2x16xf32> to vector<2x1x16xf32>
    %25 = arith.addf %22, %24 : vector<2x1x16xf32>
    %c0_24 = arith.constant 0 : index
    %c0_25 = arith.constant 0 : index
    %c0_26 = arith.constant 0 : index
    %26 = vector.load %arg9[%c0_24, %c0_25, %c0_26] : memref<2x1x16xf32, #tpu.memory_space<vmem>>, vector<2x1x16xf32>
    tpu.vector_store %arg9[%c0_24, %c0_25, %c0_26], %25 {strides = array<i32>} : memref<2x1x16xf32, #tpu.memory_space<vmem>>, vector<2x1x16xf32>,
    %c0_27 = arith.constant 0 : index
    %c0_28 = arith.constant 0 : index
    %c0_29 = arith.constant 0 : index
    %27 = vector.load %arg10[%c0_27, %c0_28, %c0_29] : memref<2x8x16xf32, #tpu.memory_space<vmem>>, vector<2x8x16xf32>
    %28 = vector.broadcast %17 : vector<2x1x16xf32> to vector<2x8x16xf32>
    %29 = arith.mulf %28, %27 : vector<2x8x16xf32>
    "tpu.trace_start"() <{level = 10 : i32, message = "hcs,hst->hct"}> : () -> ()
    %cst_30 = arith.constant dense<0.000000e+00> : vector<2x8x16xf32>
    %30 = tpu.matmul %10, %20, %cst_30 {dimension_numbers = #tpu.dot_dimension_numbers<[2], [1], [1], [2], [0, 0, 0, 1, 1, 2], [0], [0]>} : vector<2x8x16xf32>, vector<2x16x16xf32>, vector<2x8x16xf32> -> vector<2x8x16xf32>
    "tpu.trace_stop"() : () -> ()
    %31 = arith.addf %29, %30 : vector<2x8x16xf32>
    %c0_31 = arith.constant 0 : index
    %c0_32 = arith.constant 0 : index
    %c0_33 = arith.constant 0 : index
    %32 = vector.load %arg10[%c0_31, %c0_32, %c0_33] : memref<2x8x16xf32, #tpu.memory_space<vmem>>, vector<2x8x16xf32>
    tpu.vector_store %arg10[%c0_31, %c0_32, %c0_33], %31 {strides = array<i32>} : memref<2x8x16xf32, #tpu.memory_space<vmem>>, vector<2x8x16xf32>,
    %c0_34 = arith.constant 0 : index
    %c0_35 = arith.constant 0 : index
    %c0_36 = arith.constant 0 : index
    %33 = vector.load %arg8[%c0_34, %c0_35, %c0_36] : memref<2x1x16xf32, #tpu.memory_space<vmem>>, vector<2x1x16xf32>
    tpu.vector_store %arg8[%c0_34, %c0_35, %c0_36], %15 {strides = array<i32>} : memref<2x1x16xf32, #tpu.memory_space<vmem>>, vector<2x1x16xf32>,
    %c0_i32_37 = arith.constant 0 : i32
    %34 = arith.cmpi eq, %arg3, %c0_i32_37 : i32
    %35 = arith.extui %34 : i1 to i32
    %c0_i32_38 = arith.constant 0 : i32
    %36 = arith.cmpi ne, %35, %c0_i32_38 : i32
    scf.if %36 {
      %c0_39 = arith.constant 0 : index
      %c0_40 = arith.constant 0 : index
      %c0_41 = arith.constant 0 : index
      %37 = vector.load %arg9[%c0_39, %c0_40, %c0_41] : memref<2x1x16xf32, #tpu.memory_space<vmem>>, vector<2x1x16xf32>
      %38 = tpu.reciprocal %37 : vector<2x1x16xf32> -> vector<2x1x16xf32>
      %c0_42 = arith.constant 0 : index
      %c0_43 = arith.constant 0 : index
      %c0_44 = arith.constant 0 : index
      %39 = vector.load %arg10[%c0_42, %c0_43, %c0_44] : memref<2x8x16xf32, #tpu.memory_space<vmem>>, vector<2x8x16xf32>
      %40 = vector.broadcast %38 : vector<2x1x16xf32> to vector<2x8x16xf32>
      %41 = arith.mulf %39, %40 : vector<2x8x16xf32>
      %c0_45 = arith.constant 0 : index
      %c0_46 = arith.constant 0 : index
      %c0_47 = arith.constant 0 : index
      %c0_48 = arith.constant 0 : index
      %42 = vector.load %arg7[%c0_45, %c0_46, %c0_47, %c0_48] : memref<1x2x8x16xf32, #tpu.memory_space<vmem>>, vector<1x2x8x16xf32>
      %43 = vector.shape_cast %42 : vector<1x2x8x16xf32> to vector<2x8x16xf32>
      %44 = vector.shape_cast %41 : vector<2x8x16xf32> to vector<1x2x8x16xf32>
      tpu.vector_store %arg7[%c0_45, %c0_46, %c0_47, %c0_48], %44 {strides = array<i32>} : memref<1x2x8x16xf32, #tpu.memory_space<vmem>>, vector<1x2x8x16xf32>,
    } else {
    }
    return
  }
  func.func @transform_0(%arg0: i32, %arg1: i32, %arg2: i32, %arg3: i32) -> (i32, i32, i32, i32, i32) {
    %c0_i32 = arith.constant 0 : i32
    %c0_i32_0 = arith.constant 0 : i32
    %c0_i32_1 = arith.constant 0 : i32
    return %arg0, %c0_i32, %arg1, %c0_i32_0, %arg2 : i32, i32, i32, i32, i32
  }
  func.func @transform_1(%arg0: i32, %arg1: i32, %arg2: i32, %arg3: i32) -> (i32, i32, i32, i32, i32) {
    %c1_i32 = arith.constant 1 : i32
    %c0_i32 = arith.constant 0 : i32
    %c0_i32_0 = arith.constant 0 : i32
    return %arg0, %c1_i32, %arg1, %c0_i32, %arg3 : i32, i32, i32, i32, i32
  }
  func.func @transform_2(%arg0: i32, %arg1: i32, %arg2: i32, %arg3: i32) -> (i32, i32, i32, i32, i32) {
    %c2_i32 = arith.constant 2 : i32
    %c0_i32 = arith.constant 0 : i32
    %c0_i32_0 = arith.constant 0 : i32
    return %arg0, %c2_i32, %arg1, %c0_i32, %arg3 : i32, i32, i32, i32, i32
  }
  func.func @transform_3(%arg0: i32, %arg1: i32, %arg2: i32, %arg3: i32) -> (i32, i32, i32, i32) {
    %c0_i32 = arith.constant 0 : i32
    %c0_i32_0 = arith.constant 0 : i32
    return %arg0, %arg1, %c0_i32, %arg2 : i32, i32, i32, i32
  }
}

</mosaic_0001>

<bundles_post_ra>
// kernel: tpu_custom_call.1
= control target key start
LH: loop header
LB: loop body
LE: loop exit
PB: predicated region body
PF: predicated region fallthrough
CT: control target
= control target key end

     0   :  { %s1698_s0 = inlined_call_operand.hbm [shape: f32[2,3,2,8,16], index: 0, kind: input, shape index: {}]   ;;  %s1699_s1 = inlined_call_operand.hbm [shape: f32[2,3,2,8,16], index: 1, kind: input, shape index: {}]   ;;  %s1700_s2 = inlined_call_operand.hbm [shape: f32[2,3,2,8,16], index: 2, kind: input, shape index: {}]   ;;  %s1701_s3 = inlined_call_operand.hbm [shape: f32[2,2,8,16], index: 3, kind: output, shape index: {}]  }
   0x1   :  { %1711 = sst [smem:[#allocation17_spill]] %s1698_s0 }
   0x2   :  { %1712 = sst [smem:[#allocation18_spill]] %s1699_s1 }
   0x3   :  { %8 = vsyncpa [#allocation6], 0 }
   0x4   :  { %10 = vsyncpa [#allocation6 + $0x1], 0 }
   0x5   :  { %11 = vsyncpa [#allocation9], 0 }
   0x6   :  { %13 = vsyncpa [#allocation9 + $0x1], 0 }
   0x7   :  { %14 = vsyncpa [#allocation7], 0 }
   0x8   :  { %16 = vsyncpa [#allocation7 + $0x1], 0  ;;  %s1386_s12 = smov 0   ;;  %s1388_s13 = smov 0  }
   0x9   :  { %s1390_s14 = smov 0   ;;  %s1392_s15 = smov 0  }
   0xa   :  { %s1394_s16 = smov 0   ;;  %s1396_s17 = smov 0  }
   0xb LB: > { %1713 = sst [smem:[#allocation15_spill]] %s1348_s16  ;;  %s1417_s18 = sadd.s32 4294967295, %s1352_s17   ;;  %s1352_s17 = sphi %s1396_s17, %s22_s17   ;;  %s1348_s16 = sphi %s1394_s16, %s1734_s16   ;;  %s1344_s15 = sphi %s1392_s15, %s1733_s15   ;;  %s1340_s14 = sphi %s1390_s14, %s1737_s14   ;;  %s1336_s13 = sphi %s1388_s13, %s1736_s13   ;;  %s1332_s12 = sphi %s1386_s12, %s1735_s12  }
   0xc   : > { %s1009_s19 = sadd.s32 4294967294, %s1352_s17   ;;  %s48_s20 = sadd.s32 1, %s1348_s16 }
   0xd   : > { %s59_s21 = sadd.s32 1, %s1340_s14  ;;  %p50_p0 = scmp.ge.s32.totalorder %s48_s20, 2 }
   0xe   : > { %p66_p1 = scmp.ne.s32.totalorder %s1340_s14, %s1336_s13  ;;  %p67_p2 = scmp.eq.s32.totalorder %s1352_s17, 0 }
   0xf   : > { %p72_p3 = scmp.ne.s32.totalorder %s1336_s13, %s1332_s12  ;;  %s1739_s20 = smov (%p50_p0, %s48_s20), 0 }
  0x10   : > { %1714 = sst [smem:[#allocation16_spill]] %s1739_s20  ;;  %p1429_p4 = por %p67_p2, %p66_p1 }
  0x11   : > { %p73_p5 = scmp.eq.s32.totalorder %s1417_s18, 0  ;;  %s52_s23 = ssub.s32 %s1348_s16, %s1739_s20 }
  0x12   : > { %p160_p6 = scmp.eq.s32.totalorder %s1417_s18, 1  ;;  %p57_p7 = scmp.eq.s32.totalorder %s52_s23, 0 }
  0x13   : > { %p1437_p8 = por %p73_p5, %p72_p3  ;;  %p166_p10 = scmp.eq.s32.totalorder %s1009_s19, 1 }
  0x14   : > { %p1441_p9 = por %p160_p6, %p66_p1  ;;  %p1100_p13 = scmp.lt.s32.totalorder %s1352_s17, 2 }
  0x15   : > { %s1716_s24 = scalar_select %p1437_p8, 1, 0 }
  0x16   : > { %s1717_s25 = scalar_select %p1441_p9, 1, 0 }
  0x17   : > { %s1446_s26 = scalar_select %p57_p7, %s1340_s14, %s59_s21  }
  0x18   : > { %p1448_p11 = por %p166_p10, %p72_p3  ;;  %s1702_s28 = sand.u32 1, %s1340_s14  }
  0x19   : > { %s1457_s29 = sshll.u32 %s1702_s28, 4  ;;  %s1460_s30 = smul.u32 768, %s1348_s16 }
  0x1a   : > { %s1718_s27 = scalar_select %p1448_p11, 1, 0 }
  0x1b   : > { %p1464_p0 = pnand %p1100_p13, %p1429_p4  ;;  %s210_s5 = sand.u32 1, %s1352_s17  }
  0x1c   : > { %s1720_s1 = sld [smem:[#allocation18_spill]]  ;;  %s214_s10 = scalar_lea.vmem [#allocation8], %s1457_s29 }
  0x1d   : > { %s225_s11 = sshll.u32 %s214_s10, 4  ;;  %s1479_s19 = scalar_lea.sflag [#allocation9], %s210_s5  ;;  %s1476_s11 = int_to_ptr.vmem [resolvable:$true] %s225_s11 }
  0x1e   : > { %p1484_p3 = pneg %p1464_p0 }
  0x22   : > { %s907_s8 = scalar_lea.hbm %s1720_s1, %s1460_s30  ;;  %s1179_s7 = scalar_lea.hbm %s1720_s1, 1536 }
  0x23   : > { %s1473_s9 = scalar_lea.hbm %s907_s8, 256  ;;  %s1204_s21 = scalar_lea.hbm %s907_s8, 512 }
  0x24   : > { %p1175_p2 = scmp.ne.s32.totalorder %s1473_s9, %s1204_s21  ;;  %p1180_p6 = scmp.lt.u32.totalorder %s1473_s9, %s1720_s1 }
  0x25   : > { %p1181_p7 = scmp.lt.u32.totalorder %s1179_s7, %s1204_s21  ;;  %p1183_p13 = scmp.lt.u32.totalorder %s1204_s21, %s1473_s9 }
  0x26   : > { %p1177_p4 = pnand %p1484_p3, %p1175_p2 }
  0x27   : > { %p1182_p10 = por %p1181_p7, %p1180_p6 }
  0x28   : > { %p1178_p5 = pneg %p1177_p4 }
  0x29   : > { %p1184_p12 = por %p1183_p13, %p1182_p10 }
  0x2b   : > { %p1185_p1 = pnand %p1184_p12, %p1178_p5 }
  0x2d   : > { %1188 = shalt.err (!%p1185_p1)
}
  0x2e   : > { %s1189_s5 = scalar_lea.vmem %s1476_s11, 256  ;;  %s1354_s8 = smov [#allocation8]  }
  0x2f   : > { %p1190_p2 = scmp.ne.s32.totalorder %s1476_s11, %s1189_s5  ;;  %s1194_s23 = sshll.u32 %s1354_s8, 4  ;;  %s1195_s23 = int_to_ptr.vmem [resolvable:$false] %s1194_s23 }
  0x30   : > { %s1196_s28 = scalar_lea.vmem %s1195_s23, 512  ;;  %p1197_p9 = scmp.lt.s32.totalorder %s1476_s11, %s1195_s23 }
  0x31   : > { %p1192_p4 = pnand %p1190_p2, %p1484_p3  ;;  %p1198_p8 = scmp.lt.s32.totalorder %s1196_s28, %s1189_s5 }
  0x33   : > { %p1193_p11 = pneg %p1192_p4  ;;  %p1199_p6 = por %p1198_p8, %p1197_p9 }
  0x35   : > { %p1200_p7 = pnand %p1199_p6, %p1193_p11 }
  0x37   : > { %1203 = shalt.err (!%p1200_p7)
}
  0x38   : > { %s1705_s21 = smov 128   ;;  %s1707_s6 = smov 8  }
  0x39   : > { %1092 = dma.hbm_to_vmem [thread:$0]  (!%p1464_p0), %s1473_s9, 256, %s1476_s11, %s1479_s19, %s1705_s21, %s1705_s21, %s1707_s6  }
  0x3a   : > { %p258_p8 = scmp.lt.s32.totalorder %s1352_s17, 3  ;;  %p1722_p9 = scmp.ge.s32.totalorder %s1352_s17, 1 }
  0x3b   : > { %s1724_s0 = sld [smem:[#allocation17_spill]]  ;;  %s190_s23 = scalar_lea.vmem [#allocation5], %s1457_s29 }
  0x3c   : > { %p1514_p11 = pnand %p1722_p9, %p258_p8  ;;  %s200_s28 = sshll.u32 %s190_s23, 4  ;;  %s1525_s28 = int_to_ptr.vmem [resolvable:$true] %s200_s28 }
  0x3d   : > { %s1725_s9 = sand.u32 1, %s1340_s14  }
  0x3e   : > { %s1723_s7 = scalar_select %p1514_p11, 1, 0 }
  0x3f   : > { %s1529_s11 = scalar_lea.sflag [#allocation6], %s1725_s9 }
  0x41   : > { %s1522_s8 = scalar_lea.hbm %s1724_s0, %s1460_s30  ;;  %s1210_s5 = scalar_lea.hbm %s1724_s0, 1536 }
  0x42   : > { %s1205_s21 = scalar_lea.hbm %s1522_s8, 256  ;;  %p1211_p10 = scmp.lt.u32.totalorder %s1522_s8, %s1724_s0 }
  0x43   : > { %p1206_p12 = scmp.ne.s32.totalorder %s1522_s8, %s1205_s21  ;;  %p1212_p13 = scmp.lt.u32.totalorder %s1210_s5, %s1205_s21 }
  0x44   : > { %p1214_p4 = scmp.lt.u32.totalorder %s1205_s21, %s1522_s8 }
  0x45   : > { %p1208_p1 = pnand %p1206_p12, %p1484_p3  ;;  %p1213_p2 = por %p1212_p13, %p1211_p10 }
  0x47   : > { %p1209_p5 = pneg %p1208_p1  ;;  %p1215_p6 = por %p1214_p4, %p1213_p2 }
  0x49   : > { %p1216_p7 = pnand %p1215_p6, %p1209_p5 }
  0x4b   : > { %1219 = shalt.err (!%p1216_p7)
}
  0x4c   : > { %s1220_s23 = scalar_lea.vmem %s1525_s28, 256  ;;  %s1357_s6 = smov [#allocation5]  }
  0x4d   : > { %p1221_p8 = scmp.ne.s32.totalorder %s1525_s28, %s1220_s23  ;;  %s1225_s9 = sshll.u32 %s1357_s6, 4  ;;  %s1226_s9 = int_to_ptr.vmem [resolvable:$false] %s1225_s9 }
  0x4e   : > { %s1227_s1 = scalar_lea.vmem %s1226_s9, 512  ;;  %p1228_p1 = scmp.lt.s32.totalorder %s1525_s28, %s1226_s9 }
  0x4f   : > { %p1223_p9 = pnand %p1221_p8, %p1484_p3  ;;  %p1229_p11 = scmp.lt.s32.totalorder %s1227_s1, %s1220_s23 }
  0x51   : > { %p1224_p12 = pneg %p1223_p9  ;;  %p1230_p10 = por %p1229_p11, %p1228_p1 }
  0x53   : > { %p1231_p13 = pnand %p1230_p10, %p1224_p12 }
  0x55   : > { %1234 = shalt.err (!%p1231_p13)
}
  0x56   : > { %s1726_s20 = smov 8   ;;  %s1727_s21 = smov 128  }
  0x57   : > { %1089 = dma.hbm_to_vmem [thread:$0]  (!%p1464_p0), %s1522_s8, 256, %s1525_s28, %s1529_s11, %s1727_s21, %s1727_s21, %s1726_s20  }
  0x58   : > { %s917_s6 = scalar_lea.hbm %s1700_s2, %s1460_s30  ;;  %s239_s23 = scalar_lea.vmem [#allocation10], %s1457_s29 }
  0x59   : > { %s250_s9 = sshll.u32 %s239_s23, 4  ;;  %s1561_s1 = scalar_lea.hbm %s917_s6, 512  ;;  %s1563_s9 = int_to_ptr.vmem [resolvable:$true] %s250_s9 }
  0x5a   : > { %s1265_s0 = scalar_lea.hbm %s917_s6, 768  ;;  %s1240_s28 = scalar_lea.hbm %s1700_s2, 1536 }
  0x5b   : > { %p1236_p11 = scmp.ne.s32.totalorder %s1561_s1, %s1265_s0  ;;  %p1241_p4 = scmp.lt.u32.totalorder %s1561_s1, %s1700_s2 }
  0x5c   : > { %p1242_p6 = scmp.lt.u32.totalorder %s1240_s28, %s1265_s0  ;;  %p1244_p8 = scmp.lt.u32.totalorder %s1265_s0, %s1561_s1 }
  0x5d   : > { %p1238_p5 = pnand %p1236_p11, %p1484_p3 }
  0x5e   : > { %p1243_p7 = por %p1242_p6, %p1241_p4 }
  0x5f   : > { %p1239_p2 = pneg %p1238_p5 }
  0x60   : > { %p1245_p9 = por %p1244_p8, %p1243_p7 }
  0x62   : > { %p1246_p12 = pnand %p1245_p9, %p1239_p2 }
  0x64   : > { %1249 = shalt.err (!%p1246_p12)
}
  0x65   : > { %s1250_s29 = scalar_lea.vmem %s1563_s9, 256  ;;  %s1358_s16 = smov [#allocation10]  }
  0x66   : > { %p1251_p1 = scmp.ne.s32.totalorder %s1563_s9, %s1250_s29  ;;  %s1255_s10 = sshll.u32 %s1358_s16, 4  ;;  %s1256_s10 = int_to_ptr.vmem [resolvable:$false] %s1255_s10 }
  0x67   : > { %s1257_s5 = scalar_lea.vmem %s1256_s10, 512  ;;  %p1258_p11 = scmp.lt.s32.totalorder %s1563_s9, %s1256_s10 }
  0x68   : > { %p1253_p10 = pnand %p1251_p1, %p1484_p3  ;;  %p1259_p5 = scmp.lt.s32.totalorder %s1257_s5, %s1250_s29 }
  0x6a   : > { %p1254_p13 = pneg %p1253_p10  ;;  %p1260_p4 = por %p1259_p5, %p1258_p11 }
  0x6c   : > { %p1261_p6 = pnand %p1260_p4, %p1254_p13 }
  0x6e   : > { %1264 = shalt.err (!%p1261_p6)
}
  0x6f   : > { %1095 = dma.hbm_to_vmem [thread:$0]  (!%p1464_p0), %s1561_s1, 256, %s1563_s9, %s1479_s19, %s1727_s21, %s1727_s21, %s1726_s20  }
  0x70   : > { %p1728_p3 = scmp.ne.s32.totalorder %s1723_s7, 0 }
  0x71   : > { %s1592_s0 = sand.u32 (!%p1728_p3), 1, %s1336_s13   ;;  %p1729_p2 = scmp.ne.s32.totalorder (!%p1728_p3), %s1716_s24, 0 }
  0x72   : > { %262 = sbr.rel (%p1728_p3) target bundleno = 759 (0x2f7), region = 32  ;;  %s1595_s22 = sshll.u32 (!%p1728_p3), %s1592_s0, 4 }
  0x73   : > { %s265_s4 = scalar_lea.sflag (!%p1728_p3), [#allocation6], %s1592_s0  ;;  %s268_s6 = scalar_lea.vmem (!%p1728_p3), [#allocation5], %s1595_s22 }
  0x79   : > { %1319 = dma.done.wait (%p1729_p2), %s265_s4, 256  }
  0x7a   : > { %1321 = vsyncadd (%p1729_p2), %s265_s4, 4294967040  ;;  %s273_s19 = sand.u32 1, %s1417_s18   ;;  %s277_s20 = scalar_lea.vmem [#allocation8], %s1595_s22 }
  0x7b   : > { %s274_s7 = scalar_lea.sflag [#allocation9], %s273_s19 }
  0x7c   : > { %1323 = dma.done.wait (%p1729_p2), %s274_s7, 512  }
  0x7d   : > { %1325 = vsyncadd (%p1729_p2), %s274_s7, 4294966784  ;;  %v339_v0 = vld [vmem:[%s277_s20] sm:$0xff]  ;;  %v340_v3 = vld [vmem:[%s277_s20 + $0x8] sm:$0xff]  ;;  %vm375_vm0 = vcmask 64512   ;;  %vm327_vm1 = vcmask 122880   ;;  %v1359_v10 = vmov -inf   ;;  %v601_v20 = vlaneseq }
  0x7e   : > { %343 = vxpose.xlu0.b32.start.end [1/1] (short) (narrow) %v339_v0, 16  ;;  %v335_v1 = vld [vmem:[%s268_s6] sm:$0xff]  ;;  %v336_v4 = vld [vmem:[%s268_s6 + $0x8] sm:$0xff]  ;;  %328 = vst.msk [vmem:[#allocation2] sm:$0x1] %vm327_vm1, %v1359_v10  ;;  %vm332_vm2 = vcmask 130048  }
  0x7f   : > { %v337_v2 = vmul.f32 0.35355338, %v335_v1  ;;  %v338_v5 = vmul.f32 0.35355338, %v336_v4  ;;  %329 = vst.msk [vmem:[#allocation2 + $0x1] sm:$0x1] %vm327_vm1, %v1359_v10 }
  0x80   : > { %v1360_v11 = vmov 0.0   ;;  %v1361_v12 = vmov 0.0|0.0   ;;  %vm1362_vm3 = vmmov 0   ;;  %v602_v27 = vshrl.u32 %v601_v20, 7  ;;  %s286_s18 = scalar_lea.vmem [#allocation10], %s1595_s22  ;;  %s318_s24 = scalar_lea.vmem [#allocation11], %s1595_s22 }
  0x81   : > { %1047 = vmatprep.subr.mxu0 %v337_v2  ;;  %1052 = vmatprep.subr.mxu1 %v338_v5  ;;  %330 = vst.msk [vmem:[#allocation3] sm:$0x1] %vm327_vm1, %v1360_v11  ;;  %331 = vst.msk [vmem:[#allocation3 + $0x1] sm:$0x1] %vm327_vm1, %v1360_v11  ;;  %v341_v0 = vld [vmem:[%s286_s18] sm:$0xff]  ;;  %s1034_s21 = sshll.u32 %s1344_s15, 8 }
  0x82   : > { %1048 = vmatpush3.msra.mxu0 %v337_v2  ;;  %1053 = vmatpush3.msra.mxu1 %v338_v5  ;;  %333 = vst.msk [vmem:[#allocation4] sm:$0xff] %vm332_vm2, %v1360_v11  ;;  %334 = vst.msk [vmem:[#allocation4 + $0x8] sm:$0xff] %vm332_vm2, %v1360_v11  ;;  %v1619_v33 = vsub.s32 0, %v602_v27  ;;  %s860_s23 = sshll.u32 %s318_s24, 4  ;;  %s1646_s8 = scalar_lea.hbm %s1701_s3, %s1034_s21  ;;  %s1648_s23 = int_to_ptr.vmem [resolvable:$true] %s860_s23 }
  0x83   : > { %457 = vxpose.xlu0.b32.start.end [1/1] (short) (narrow) %v340_v3, 16  ;;  %1071 = vmatprep.subr.bf16.mxu0 %v1361_v12  ;;  %s844_s28 = scalar_lea.sflag [#allocation7], %s1592_s0  ;;  %s1266_s11 = scalar_lea.vmem %s1648_s23, 256 }
  0x84   : > { %1074 = vmatprep.subr.bf16.mxu1 %v1361_v12  ;;  %p1267_p0 = scmp.ne.s32.totalorder %s1648_s23, %s1266_s11  ;;  %p1730_p7 = scmp.ne.s32.totalorder %s1717_s25, 0 }
  0x85   : > { %v570_v31 = vld [vmem:[#allocation2] sm:$0x1]  ;;  %s1363_s15 = smov [#allocation11]  }
  0x86   : > { %v571_v44 = vld [vmem:[#allocation2 + $0x1] sm:$0x1]  ;;  %p1268_p8 = pnand %p1267_p0, %p1730_p7  ;;  %s1270_s30 = sshll.u32 %s1363_s15, 4  ;;  %s1271_s30 = int_to_ptr.vmem [resolvable:$false] %s1270_s30 }
  0x87   : > { %s1272_s29 = scalar_lea.vmem %s1271_s30, 512  ;;  %p1273_p12 = scmp.lt.s32.totalorder %s1648_s23, %s1271_s30 }
  0x88   : > { %p1269_p9 = pneg %p1268_p8  ;;  %p1274_p1 = scmp.lt.s32.totalorder %s1272_s29, %s1266_s11 }
  0x8a   : > { %p1275_p10 = por %p1274_p1, %p1273_p12 }
  0x8c   : > { %p1276_p13 = pnand %p1275_p10, %p1269_p9 }
  0xfe   : > { %v359_v6 = vpop.trf.xlu0 }
  0xff   : > { %1049 = vmatprep.mubr.msk.f32.mxu0 %vm375_vm0, %v359_v6 }
 0x102   : > { %v360_v7 = vpop.trf.xlu0 }
 0x103   : > { %1050 = vmatmul.mubr.msk.f32.vlgmr.msra.gmra.mrb[0].mxu0 %vm375_vm0, %v360_v7 }
 0x104   : > { %1061 = vmatprep.mubr.msk.f32.mxu0 %vm1362_vm3, %v1360_v11 }
 0x106   : > { %v473_v8 = vpop.trf.xlu0 }
 0x107   : > { %1054 = vmatprep.mubr.msk.f32.mxu1 %vm375_vm0, %v473_v8 }
 0x10a   : > { %v474_v9 = vpop.trf.xlu0 }
 0x10b   : > { %1055 = vmatmul.mubr.msk.f32.vlgmr.msra.gmra.mrb[0].mxu1 %vm375_vm0, %v474_v9 }
 0x10c   : > { %1068 = vmatprep.mubr.msk.f32.mxu1 %vm1362_vm3, %v1360_v11 }
 0x1d6   : > { %v1051_v13 = vpop.f32.mrb[0].mxu0 }
 0x1d7   : > { %v574_v14 = vsel %vm332_vm2, %v1051_v13, -inf  ;;  %v448_v15 = vpop.f32.mrb[1].mxu0 }
 0x1d8   : > { %v573_v16 = vsel %vm332_vm2, %v448_v15, -inf }
 0x1d9   : > { %v575_v17 = vmax.f32 %v573_v16, %v574_v14  ;;  %v342_v14 = vld [vmem:[%s286_s18 + $0x8] sm:$0xff] }
 0x1db   : > { %v576_v18 = vrot.slane %v575_v17, 4 }
 0x1dd   : > { %v577_v19 = vmax.f32 %v575_v17, %v576_v18 }
 0x1de   : > { %v1056_v21 = vpop.f32.mrb[0].mxu1 }
 0x1df   : > { %v578_v22 = vrot.slane %v577_v19, 2  ;;  %v583_v23 = vsel %vm332_vm2, %v1056_v21, -inf  ;;  %v561_v24 = vpop.f32.mrb[1].mxu1 }
 0x1e0   : > { %v582_v25 = vsel %vm332_vm2, %v561_v24, -inf }
 0x1e1   : > { %v579_v26 = vmax.f32 %v577_v19, %v578_v22  ;;  %v584_v28 = vmax.f32 %v582_v25, %v583_v23  ;;  %v624_v23 = vld [vmem:[#allocation3 + $0x1] sm:$0x1] }
 0x1e3   : > { %v580_v29 = vrot.slane %v579_v26, 1  ;;  %v585_v30 = vrot.slane %v584_v28, 4 }
 0x1e5   : > { %v581_v32 = vmax.f32 %v579_v26, %v580_v29  ;;  %v586_v34 = vmax.f32 %v584_v28, %v585_v30  ;;  %v650_v29 = vld [vmem:[#allocation4] sm:$0xff] }
 0x1e7   : > { %v591_v35 = vmax.f32 %v570_v31, %v581_v32  ;;  %v587_v36 = vrot.slane %v586_v34, 2 }
 0x1e9   : > { %v593_v37 = vsub.f32 %v570_v31, %v591_v35  ;;  %v604_v38 = vrot.slane %v591_v35, %v1619_v33  ;;  %816 = vst.msk [vmem:[#allocation2] sm:$0x1] %vm327_vm1, %v591_v35  ;;  %v588_v39 = vmax.f32 %v586_v34, %v587_v36  ;;  %v651_v36 = vld [vmem:[#allocation4 + $0x8] sm:$0xff] }
 0x1eb   : > { %v595_v40 = vmul.f32 1.442695, %v593_v37  ;;  %v611_v41 = vsub.f32 %v448_v15, %v604_v38  ;;  %v612_v42 = vsub.f32 %v1051_v13, %v604_v38  ;;  %v589_v43 = vrot.slane %v588_v39, 1  ;;  %v623_v13 = vld [vmem:[#allocation3] sm:$0x1] }
 0x1ed   : > { %1158 = vpow2.f32 %v595_v40  ;;  %v615_v45 = vmul.f32 1.442695, %v611_v41  ;;  %v617_v46 = vmul.f32 1.442695, %v612_v42  ;;  %v590_v47 = vmax.f32 %v588_v39, %v589_v43 }
 0x1ef   : > { %1160 = vpow2.f32 %v615_v45  ;;  %v592_v48 = vmax.f32 %v571_v44, %v590_v47 }
 0x1f0   : > { %1162 = vpow2.f32 %v617_v46 }
 0x1f1   : > { %v594_v49 = vsub.f32 %v571_v44, %v592_v48  ;;  %v608_v50 = vrot.slane %v592_v48, %v1619_v33  ;;  %817 = vst.msk [vmem:[#allocation2 + $0x1] sm:$0x1] %vm327_vm1, %v592_v48 }
 0x1f3   : > { %v597_v51 = vmul.f32 1.442695, %v594_v49  ;;  %v613_v52 = vsub.f32 %v561_v24, %v608_v50  ;;  %v614_v53 = vsub.f32 %v1056_v21, %v608_v50 }
 0x1f5   : > { %1164 = vpow2.f32 %v597_v51  ;;  %v619_v54 = vmul.f32 1.442695, %v613_v52  ;;  %v621_v55 = vmul.f32 1.442695, %v614_v53 }
 0x1f7   : > { %v1159_v56 = vpop.eup %1158  ;;  %1166 = vpow2.f32 %v619_v54 }
 0x1f8   : > { %1168 = vpow2.f32 %v621_v55  ;;  %v657_v57 = vrot.slane %v1159_v56, %v1619_v33  ;;  %v625_v19 = vmul.f32 %v1159_v56, %v623_v13 }
 0x1f9   : > { %v1161_v58 = vpop.eup %1160 }
 0x1fa   : > { %v1163_v59 = vpop.eup %1162  ;;  %v627_v60 = vsel %vm332_vm2, %v1161_v58, 0.0  ;;  %v664_v30 = vmul.f32 %v657_v57, %v650_v29 }
 0x1fb   : > { %v628_v61 = vsel %vm332_vm2, %v1163_v59, 0.0  ;;  %v1072_v62 = vpack.c.bf16 %v1163_v59, %v1161_v58 }
 0x1fc   : > { %v629_v63 = vadd.f32 %v628_v61, %v627_v60 }
 0x1fd   : > { %1073 = vmatpush3.bf16.msra.mxu0 %v1072_v62 }
 0x1fe   : > { %v630_v1 = vrot.slane %v629_v63, 4 }
 0x1ff   : > { %v1165_v2 = vpop.eup %1164 }
 0x200   : > { %v631_v3 = vadd.f32 %v630_v1, %v629_v63  ;;  %1062 = vmatmul.mubr.msk.f32.vlgmr.msra.gmra.mrb[2].mxu0 %vm332_vm2, %v341_v0  ;;  %v661_v4 = vrot.slane %v1165_v2, %v1619_v33  ;;  %v626_v26 = vmul.f32 %v1165_v2, %v624_v23 }
 0x201   : > { %v1167_v5 = vpop.eup %1166 }
 0x202   : > { %v1169_v6 = vpop.eup %1168  ;;  %v632_v7 = vrot.slane %v631_v3, 2  ;;  %v636_v8 = vsel %vm332_vm2, %v1167_v5, 0.0  ;;  %v665_v38 = vmul.f32 %v661_v4, %v651_v36 }
 0x203   : > { %v637_v9 = vsel %vm332_vm2, %v1169_v6, 0.0  ;;  %v1075_v10 = vpack.c.bf16 %v1169_v6, %v1167_v5 }
 0x204   : > { %v633_v11 = vadd.f32 %v632_v7, %v631_v3  ;;  %v638_v12 = vadd.f32 %v637_v9, %v636_v8 }
 0x205   : > { %1076 = vmatpush3.bf16.msra.mxu1 %v1075_v10 }
 0x206   : > { %v634_v15 = vrot.slane %v633_v11, 1  ;;  %v639_v16 = vrot.slane %v638_v12, 4 }
 0x208   : > { %v635_v17 = vadd.f32 %v634_v15, %v633_v11  ;;  %v640_v18 = vadd.f32 %v639_v16, %v638_v12  ;;  %1069 = vmatmul.mubr.msk.f32.vlgmr.msra.gmra.mrb[2].mxu1 %vm332_vm2, %v342_v14 }
 0x20a   : > { %v641_v20 = vrot.slane %v640_v18, 2  ;;  %v645_v21 = vadd.f32 %v635_v17, %v625_v19 }
 0x20c   : > { %v642_v22 = vadd.f32 %v641_v20, %v640_v18  ;;  %648 = vst.msk [vmem:[#allocation3] sm:$0x1] %vm327_vm1, %v645_v21 }
 0x20e   : > { %v643_v24 = vrot.slane %v642_v22, 1 }
 0x210   : > { %v644_v25 = vadd.f32 %v643_v24, %v642_v22 }
 0x212   : > { %v646_v27 = vadd.f32 %v644_v25, %v626_v26 }
 0x213   : > { %v821_v28 = vld [vmem:[#allocation3] sm:$0x1] }
 0x214   : > { %649 = vst.msk [vmem:[#allocation3 + $0x1] sm:$0x1] %vm327_vm1, %v646_v27  ;;  %1170 = vrcp.f32 %v821_v28 }
 0x21b   : > { %v822_v35 = vld [vmem:[#allocation3 + $0x1] sm:$0x1] }
 0x21c   : > { %1172 = vrcp.f32 %v822_v35 }
 0x21e   : > { %v1171_v37 = vpop.eup %1170 }
 0x21f   : > { %v832_v42 = vrot.slane %v1171_v37, %v1619_v33 }
 0x226   : > { %v1173_v45 = vpop.eup %1172 }
 0x227   : > { %v836_v46 = vrot.slane %v1173_v45, %v1619_v33 }
 0x2d3   : > { %v735_v31 = vpop.f32.mrb[2].mxu0 }
 0x2d4   : > { %v812_v32 = vadd.f32 %v735_v31, %v664_v30  ;;  %v1063_v34 = vpop.f32.mrb[3].mxu0 }
 0x2d6   : > { %814 = vst.msk [vmem:[#allocation4] sm:$0xff] %vm332_vm2, %v812_v32 }
 0x2db   : > { %v808_v39 = vpop.f32.mrb[2].mxu1 }
 0x2dc   : > { %v813_v40 = vadd.f32 %v808_v39, %v665_v38  ;;  %v1070_v41 = vpop.f32.mrb[3].mxu1 }
 0x2dd   : > { %v825_v43 = vld [vmem:[#allocation4] sm:$0xff] }
 0x2de   : > { %815 = vst.msk [vmem:[#allocation4 + $0x8] sm:$0xff] %vm332_vm2, %v813_v40  ;;  %v839_v44 = vmul.f32 %v832_v42, %v825_v43 }
 0x2e0   : > { %841 = vst.msk [vmem:[%s318_s24] sm:$0xff] %vm332_vm2, %v839_v44 }
 0x2e5   : > { %v826_v47 = vld [vmem:[#allocation4 + $0x8] sm:$0xff] }
 0x2e6   : > { %v840_v48 = vmul.f32 %v836_v46, %v826_v47 }
 0x2e8   : > { %842 = vst.msk [vmem:[%s318_s24 + $0x8] sm:$0xff] %vm332_vm2, %v840_v48 }
 0x2e9   : > { %1279 = shalt.err (!%p1276_p13)
}
 0x2ea   : > { %s1280_s16 = scalar_lea.hbm %s1646_s8, 256  ;;  %s1284_s22 = scalar_lea.hbm %s1701_s3, 512 }
 0x2eb   : > { %p1281_p11 = scmp.ne.s32.totalorder %s1646_s8, %s1280_s16  ;;  %p1285_p6 = scmp.lt.u32.totalorder %s1646_s8, %s1701_s3 }
 0x2ec   : > { %p1286_p3 = scmp.lt.u32.totalorder %s1284_s22, %s1280_s16  ;;  %p1288_p0 = scmp.lt.u32.totalorder %s1280_s16, %s1646_s8 }
 0x2ed   : > { %p1282_p5 = pnand %p1281_p11, %p1730_p7 }
 0x2ee   : > { %p1287_p2 = por %p1286_p3, %p1285_p6 }
 0x2ef   : > { %p1283_p4 = pneg %p1282_p5 }
 0x2f0   : > { %p1289_p8 = por %p1288_p0, %p1287_p2 }
 0x2f2   : > { %p1290_p9 = pnand %p1289_p8, %p1283_p4 }
 0x2f4   : > { %1293 = shalt.err (!%p1290_p9)
}
 0x2f5   : > { %s1364_s19 = smov 128   ;;  %s1365_s7 = smov 8  }
 0x2f6   : > { %1084 = dma.vmem_to_hbm [thread:$0]  (%p1730_p7), %s1648_s23, 256, %s1646_s8, %s844_s28, %s1364_s19, %s1364_s19, %s1365_s7  }
 0x2f7 PF: > { %s875_s20 = sand.u32 1, %s1332_s12   ;;  %p1731_p12 = scmp.ne.s32.totalorder %s1718_s27, 0 }
 0x2f8   : > { %p1732_p1 = scmp.ge.s32.totalorder %s1352_s17, 2  ;;  %s876_s18 = scalar_lea.sflag [#allocation7], %s875_s20 }
 0x2fa   : > { %p1097_p10 = pnand %p1732_p1, %p1731_p12 }
 0x2fc   : > { %1327 = dma.done.wait (!%p1097_p10), %s876_s18, 256  }
 0x2fd   : > { %1329 = vsyncadd (!%p1097_p10), %s876_s18, 4294967040  ;;  %s22_s17 = sadd.s32 1, %s1352_s17   ;;  %s1733_s15 = sld [smem:[#allocation15_spill]] }
 0x2fe   : > { %p19_p13 = scmp.ge.s32.totalorder %s22_s17, 4   ;;  %s1734_s16 = sld [smem:[#allocation16_spill]] }
 0x2ff   : > { %s1735_s12 = smov %s1336_s13  ;;  %s1736_s13 = smov %s1340_s14 }
 0x300   : > { %s1737_s14 = smov %s1446_s26  ;;  %21 = sbr.rel (!%p19_p13) target bundleno = 11 (0xb), region = 109 }
 0x307   :  { %881 = vsyncpa [#allocation6], 1 }
 0x308   :  { %883 = vsyncpa [#allocation6 + $0x1], 1 }
 0x309   :  { %884 = vsyncpa [#allocation9], 1 }
 0x30a   :  { %886 = vsyncpa [#allocation9 + $0x1], 1 }
 0x30b   :  { %887 = vsyncpa [#allocation7], 1 }
 0x30c   :  { %889 = vsyncpa [#allocation7 + $0x1], 1 }

</bundles_post_ra>
